<compile_context>
chip_gen: v7x
topology: tpu7x:2x2x1
jax: 0.10.0
libtpu: 0.0.40
codegen_flags: <defaults>
</compile_context>

<pallas_src>
import functools
from statistics import NormalDist

import jax
import jax.numpy as jnp
from jax.experimental import pallas as pl
from jax.experimental.pallas import tpu as pltpu

# args.act_range in the reference code is a runtime hyperparameter; default here.
ACT_RANGE = 1.0

_INV_SQRT2 = 0.7071067811865476
_SQRT_2_OVER_PI = 0.7978845608028654

# Below this many elements, pallas_call launch/pipeline setup dominates -> plain JAX
# (which XLA can also fuse into the producer/consumer, removing the HBM round trip).
_SMALL_FASTPATH_ELEMS = 1 << 15


# ---------------------------------------------------------------------------
# Elementwise math (shared by the Pallas kernel, the small-tensor fast path and
# the ragged-tail path so all three agree bit-for-bit).
# ---------------------------------------------------------------------------

def _cdf_exact(x):
    """Standard normal CDF via erf (exact, VALU polynomial)."""
    return 0.5 * (1.0 + jax.lax.erf(x * _INV_SQRT2))


def _cdf_tanh(x):
    """GELU-style tanh approximation of the standard normal CDF.

    Max error ~1e-4, far below the half-bucket width (>= 1/510) for a_bit <= 8.
    tanh executes on the EUP slot, freeing the VALU (binding unit on v6e/v7x).
    """
    return 0.5 * (1.0 + jnp.tanh(_SQRT_2_OVER_PI * (x + 0.044715 * (x * x * x))))


def _thresholds_for(a_bit):
    """x-space bucket boundaries: round(cdf(x)*n) == level  <=>  count of x >= t_j."""
    n = 2 ** a_bit - 1
    nd = NormalDist()
    return tuple(nd.inv_cdf((j + 0.5) / n) for j in range(n))


def _quantize_elementwise(x, *, a_bit, act_range, use_tanh_cdf, thresholds):
    """CDF -> k-bit uniform quantize -> rescale, in x's (compute) dtype."""
    if thresholds is not None:
        # a_bit in {2, 3}: pure compare/add in x-space; exact bucket semantics,
        # 2n VALU ops instead of the erf polynomial.
        n = 2 ** a_bit - 1
        step = 2.0 * act_range / n
        out = jnp.full_like(x, -act_range)
        for t in thresholds:
            out = out + jnp.where(x >= t, step, 0.0).astype(x.dtype)
        return out

    cdf = _cdf_tanh(x) if use_tanh_cdf else _cdf_exact(x)
    if a_bit == 32:
        # a_bit == 32 (and stage == 'align'): the module returns the CDF itself.
        return cdf
    if a_bit == 1:
        # Faithful to the reference: sign is applied to the CDF (which lies in [0,1]).
        return (jnp.sign(cdf) * 2.0 - 1.0) * act_range
    n = float(2 ** a_bit - 1)
    return jnp.round(cdf * n) * (2.0 * act_range / n) - act_range


def _act_quant_kernel(x_ref, o_ref, *, a_bit, act_range, use_tanh_cdf, thresholds,
                      compute_dtype):
    x = x_ref[...].astype(compute_dtype)
    out = _quantize_elementwise(x, a_bit=a_bit, act_range=act_range,
                                use_tanh_cdf=use_tanh_cdf, thresholds=thresholds)
    o_ref[...] = out.astype(o_ref.dtype)


# ---------------------------------------------------------------------------
# Wrapper
# ---------------------------------------------------------------------------

def activation_quantize_fwd(
    x,
    a_bit=4,
    stage="align",
    act_range=ACT_RANGE,
    *,
    block_bytes=4 * 1024 * 1024,   # ~4 MiB tile; in+out double-buffered = ~16 MiB VMEM
    force_pallas=False,
    compute_dtype=None,            # default f32; jnp.bfloat16 is an opt-in (v6e/v7x only)
    use_tanh_cdf=None,             # default: True for 4 <= a_bit <= 8
    donate_input=False,            # alias the output onto the input HBM buffer
):
    """JAX/Pallas equivalent of activation_quantize_fn(a_bit, stage).forward(x)."""
    if a_bit == 32 and stage != "align":
        # Pure passthrough branch (no compute).
        return x

    orig_shape = x.shape
    orig_dtype = x.dtype
    total = int(x.size)
    if total == 0:
        return x

    act_range = float(act_range)
    if compute_dtype is None:
        # TODO(synk): bf16 compute (skip the f32 upcast) is profitable on v6e/v7x
        # when the input is bf16 and a_bit <= 8; keep f32 by default (v5e-safe).
        compute_dtype = jnp.float32
    thresholds = _thresholds_for(a_bit) if a_bit in (2, 3) else None
    if use_tanh_cdf is None:
        use_tanh_cdf = (thresholds is None) and (2 <= a_bit <= 8)

    def plain(v):
        y = _quantize_elementwise(v.astype(compute_dtype), a_bit=a_bit,
                                  act_range=act_range, use_tanh_cdf=use_tanh_cdf,
                                  thresholds=thresholds)
        return y.astype(orig_dtype)

    if (not force_pallas) and total < _SMALL_FASTPATH_ELEMS:
        # Launch overhead would dwarf the work; XLA fuses this into neighbors.
        return plain(x)

    flat = x.reshape(-1)

    # Widest lane-dense slab width that divides the element count -> the common case
    # needs no pad and no copy (reshape of a contiguous array is free).
    width = None
    for cand in (1024, 512, 256, 128):
        if total % cand == 0:
            width = cand
            break

    tail = None
    if width is None:
        # Ragged size: stream the 128-divisible prefix through the kernel and handle
        # the (<128-element) tail with plain JAX -- avoids a full-tensor pad + slice
        # (each of which is an extra HBM read+write of the whole tensor).
        width = 128
        main = (total // width) * width
        if main == 0:
            return plain(x)
        tail = flat[main:]
        flat = flat[:main]
    rows = flat.size // width

    # Dtype-aware tile sizing: account for the element size and the sublane packing
    # (f32: 8, bf16/f16: 16, int8/fp8: 32) so sub-32-bit stores stay unmasked.
    itemsize = jnp.dtype(orig_dtype).itemsize
    sublane = max(8, 32 // itemsize)
    block_rows = max(sublane, (block_bytes // (width * itemsize)) // sublane * sublane)
    if rows > sublane:
        # Guarantee at least 2 grid steps so v7x's two TensorCores both get work
        # under dimension_semantics=("parallel",).  No-op on v5e/v6e (1 TC).
        cap = pl.cdiv(pl.cdiv(rows, 2), sublane) * sublane
        block_rows = min(block_rows, cap)
    if block_rows >= rows:
        block_rows = rows          # single full-extent block (always legal)
    grid = pl.cdiv(rows, block_rows)   # partial last block handled by Pallas masking

    # Explicit VMEM budget: in + out, double-buffered, plus slack; capped well below
    # v7x's 64 MiB physical VMEM.
    tile_bytes = block_rows * width * itemsize
    vmem_limit = int(min(48 << 20, max(16 << 20, 4 * tile_bytes + (4 << 20))))

    x2 = flat.reshape(rows, width)
    kernel = functools.partial(
        _act_quant_kernel, a_bit=a_bit, act_range=act_range,
        use_tanh_cdf=use_tanh_cdf, thresholds=thresholds, compute_dtype=compute_dtype)

    out2 = pl.pallas_call(
        kernel,
        out_shape=jax.ShapeDtypeStruct((rows, width), orig_dtype),
        grid_spec=pltpu.PrefetchScalarGridSpec(
            num_scalar_prefetch=0,
            grid=(grid,),
            in_specs=[pl.BlockSpec((block_rows, width), lambda i: (i, 0))],
            out_specs=pl.BlockSpec((block_rows, width), lambda i: (i, 0)),
        ),
        compiler_params=pltpu.CompilerParams(
            dimension_semantics=("parallel",),
            vmem_limit_bytes=vmem_limit,
        ),
        input_output_aliases=({0: 0} if donate_input else {}),
    )(x2)

    out_flat = out2.reshape(-1)
    if tail is not None:
        out_flat = jnp.concatenate([out_flat, plain(tail)])
    return out_flat.reshape(orig_shape)


# ---------------------------------------------------------------------------
# Reference + checks
# ---------------------------------------------------------------------------

def _reference_exact(x, a_bit, stage, act_range=ACT_RANGE):
    """Plain-JAX mirror of the PyTorch module (erf-based CDF)."""
    if a_bit == 32 and stage != "align":
        return x
    cdf = _cdf_exact(x.astype(jnp.float32))
    if a_bit == 32:
        return cdf.astype(x.dtype)
    if a_bit == 1:
        q = jnp.sign(cdf)
    else:
        n = float(2 ** a_bit - 1)
        q = jnp.round(cdf * n) / n
    return ((q * 2.0 - 1.0) * act_range).astype(x.dtype)


def _check_quantized(out, ref, a_bit, act_range=ACT_RANGE, max_flip_frac=0.01,
                     flip_tol=1e-3):
    """Outputs may differ from `ref` only by a single quantization level, and only
    for the (tiny) fraction of inputs that sit within the CDF error of a bucket
    boundary."""
    bucket = 2.0 * act_range / (2 ** a_bit - 1)
    diff = jnp.abs(out.astype(jnp.float32) - ref.astype(jnp.float32))
    assert float(jnp.max(diff)) <= bucket + 2.0 * flip_tol, float(jnp.max(diff))
    flip_frac = float(jnp.mean((diff > flip_tol).astype(jnp.float32)))
    assert flip_frac <= max_flip_frac, flip_frac


if __name__ == "__main__":
    k1, k2, k3 = jax.random.split(jax.random.PRNGKey(0), 3)
    stage = "align"

    # 1) Small NCHW activation (2,4,16,16), a_bit=4 (tanh-CDF path), forced Pallas.
    x = jax.random.normal(k1, (2, 4, 16, 16), dtype=jnp.float32)
    out = jax.block_until_ready(
        activation_quantize_fwd(x, a_bit=4, stage=stage, force_pallas=True))
    assert out.shape == x.shape and out.dtype == x.dtype
    # vs. same-math plain-JAX path: identical up to bucket flips at ulp boundaries.
    ref_tanh = _quantize_elementwise(x, a_bit=4, act_range=ACT_RANGE,
                                     use_tanh_cdf=True, thresholds=None)
    _check_quantized(out, ref_tanh, a_bit=4, max_flip_frac=0.01)
    # vs. exact erf reference: off by at most one level, only near bucket boundaries.
    _check_quantized(out, _reference_exact(x, 4, stage), a_bit=4, max_flip_frac=0.06)
    # Small-tensor fast path (plain JAX) obeys the same bound.
    out_fast = jax.block_until_ready(activation_quantize_fwd(x, a_bit=4, stage=stage))
    _check_quantized(out_fast, _reference_exact(x, 4, stage), a_bit=4, max_flip_frac=0.06)

    # 2) a_bit=2 (threshold-compare path): matches the exact reference.
    out2 = jax.block_until_ready(
        activation_quantize_fwd(x, a_bit=2, stage=stage, force_pallas=True))
    _check_quantized(out2, _reference_exact(x, 2, stage), a_bit=2, max_flip_frac=0.01)

    # 3) a_bit=32, stage='align': kernel returns the exact-erf CDF.
    out32 = jax.block_until_ready(
        activation_quantize_fwd(x, a_bit=32, stage=stage, force_pallas=True))
    assert jnp.allclose(out32, _reference_exact(x, 32, stage), atol=1e-5, rtol=1e-5)
    # a_bit=32, other stage: pure passthrough.
    assert jnp.array_equal(activation_quantize_fwd(x, a_bit=32, stage="quant"), x)

    # 4) Multi-block path: (5,4,32,32) -> (20,1024) slab; default sizing gives grid=2
    #    (v7x megacore), tiny block_bytes forces grid=3 with a masked partial block.
    x_mb = jax.random.normal(k2, (5, 4, 32, 32), dtype=jnp.float32)
    ref_mb = _reference_exact(x_mb, 4, stage)
    out_mb = jax.block_until_ready(
        activation_quantize_fwd(x_mb, a_bit=4, stage=stage, force_pallas=True))
    _check_quantized(out_mb, ref_mb, a_bit=4, max_flip_frac=0.06)
    out_mb3 = jax.block_until_ready(activation_quantize_fwd(
        x_mb, a_bit=4, stage=stage, force_pallas=True, block_bytes=32 * 1024))
    _check_quantized(out_mb3, ref_mb, a_bit=4, max_flip_frac=0.06)

    # 5) Ragged size (231 elements): Pallas prefix + plain-JAX tail, no pad/slice.
    x_rg = jax.random.normal(k3, (3, 7, 11), dtype=jnp.float32)
    out_rg = jax.block_until_ready(
        activation_quantize_fwd(x_rg, a_bit=4, stage=stage, force_pallas=True))
    assert out_rg.shape == x_rg.shape and out_rg.dtype == x_rg.dtype
    _check_quantized(out_rg, _reference_exact(x_rg, 4, stage), a_bit=4, max_flip_frac=0.06)

    # 6) bf16 I/O (dtype-aware tiling; compute stays f32).
    x_bf = x.astype(jnp.bfloat16)
    out_bf = jax.block_until_ready(
        activation_quantize_fwd(x_bf, a_bit=4, stage=stage, force_pallas=True))
    assert out_bf.dtype == jnp.bfloat16 and out_bf.shape == x_bf.shape
    ref_bf = _quantize_elementwise(x_bf.astype(jnp.float32), a_bit=4, act_range=ACT_RANGE,
                                   use_tanh_cdf=True, thresholds=None).astype(jnp.bfloat16)
    _check_quantized(out_bf, ref_bf, a_bit=4, max_flip_frac=0.01, flip_tol=1e-2)

    print("KERNEL_OK")
</pallas_src>

<mosaic_0001>
module attributes {stable_mosaic.version = 11 : i64} {
  func.func @_act_quant_kernel(%arg0: i32, %arg1: memref<2x1024xf32, #tpu.memory_space<vmem>>, %arg2: memref<2x1024xf32, #tpu.memory_space<vmem>>) attributes {dimension_semantics = [#tpu.dimension_semantics<parallel>], iteration_bounds = array<i64: 1>, scalar_prefetch = 0 : i64, scratch_operands = 0 : i64, tpu.core_type = #tpu.core_type<tc>, window_params = [{transform_indices = @transform_0, window_bounds = array<i64: 2, 1024>}, {transform_indices = @transform_1, window_bounds = array<i64: 2, 1024>}]} {
    %c0 = arith.constant 0 : index
    %c0_0 = arith.constant 0 : index
    %0 = vector.load %arg1[%c0, %c0_0] : memref<2x1024xf32, #tpu.memory_space<vmem>>, vector<2x1024xf32>
    %1 = arith.mulf %0, %0 : vector<2x1024xf32>
    %2 = arith.mulf %1, %0 : vector<2x1024xf32>
    %cst = arith.constant 4.471500e-02 : f32
    %3 = vector.broadcast %cst : f32 to vector<2x1024xf32>
    %4 = arith.mulf %3, %2 : vector<2x1024xf32>
    %5 = arith.addf %0, %4 : vector<2x1024xf32>
    %cst_1 = arith.constant 0.797884583 : f32
    %6 = vector.broadcast %cst_1 : f32 to vector<2x1024xf32>
    %7 = arith.mulf %6, %5 : vector<2x1024xf32>
    %8 = math.tanh %7 : vector<2x1024xf32>
    %cst_2 = arith.constant 1.000000e+00 : f32
    %9 = vector.broadcast %cst_2 : f32 to vector<2x1024xf32>
    %10 = arith.addf %9, %8 : vector<2x1024xf32>
    %cst_3 = arith.constant 5.000000e-01 : f32
    %11 = vector.broadcast %cst_3 : f32 to vector<2x1024xf32>
    %12 = arith.mulf %11, %10 : vector<2x1024xf32>
    %cst_4 = arith.constant 1.500000e+01 : f32
    %13 = vector.broadcast %cst_4 : f32 to vector<2x1024xf32>
    %14 = arith.mulf %12, %13 : vector<2x1024xf32>
    %15 = math.roundeven %14 : vector<2x1024xf32>
    %cst_5 = arith.constant 0.13333334 : f32
    %16 = vector.broadcast %cst_5 : f32 to vector<2x1024xf32>
    %17 = arith.mulf %15, %16 : vector<2x1024xf32>
    %cst_6 = arith.constant 1.000000e+00 : f32
    %18 = vector.broadcast %cst_6 : f32 to vector<2x1024xf32>
    %19 = arith.subf %17, %18 : vector<2x1024xf32>
    %c0_7 = arith.constant 0 : index
    %c0_8 = arith.constant 0 : index
    %20 = vector.load %arg2[%c0_7, %c0_8] : memref<2x1024xf32, #tpu.memory_space<vmem>>, vector<2x1024xf32>
    tpu.vector_store %arg2[%c0_7, %c0_8], %19 {strides = array<i32>} : memref<2x1024xf32, #tpu.memory_space<vmem>>, vector<2x1024xf32>,
    return
  }
  func.func @transform_0(%arg0: i32) -> (i32, i32) {
    %c0_i32 = arith.constant 0 : i32
    %c0_i32_0 = arith.constant 0 : i32
    return %arg0, %c0_i32 : i32, i32
  }
  func.func @transform_1(%arg0: i32) -> (i32, i32) {
    %c0_i32 = arith.constant 0 : i32
    %c0_i32_0 = arith.constant 0 : i32
    return %arg0, %c0_i32 : i32, i32
  }
}

</mosaic_0001>

<bundles_post_ra>
// kernel: tpu_custom_call.1
= control target key start
LH: loop header
LB: loop body
LE: loop exit
PB: predicated region body
PF: predicated region fallthrough
CT: control target
= control target key end

     0   :  { %6 = vsyncpa [#allocation3], 0  ;;  %s158_s0 = inlined_call_operand.hbm [shape: f32[2,1024], index: 0, kind: input, shape index: {}]   ;;  %s159_s1 = inlined_call_operand.hbm [shape: f32[2,1024], index: 1, kind: output, shape index: {}]  }
   0x1   :  { %7 = vsyncpa [#allocation4], 0  ;;  %s122_s6 = smov [#allocation2]   ;;  %s74_s10 = scalar_lea.hbm %s158_s0, 256 }
   0x2   :  { %s14_s7 = sshll.u32 %s122_s6, 4  ;;  %p75_p0 = scmp.ne.s32.totalorder %s158_s0, %s74_s10  ;;  %s15_s7 = int_to_ptr.vmem [resolvable:$true] %s14_s7 }
   0x3   :  { %p78_p1 = scmp.lt.u32.totalorder %s74_s10, %s158_s0 }
   0x5   :  { %p80_p2 = pnand %p78_p1, %p75_p0 }
   0x7   :  { %83 = shalt.err (!%p80_p2)
}
   0x8   :  { %s84_s15 = scalar_lea.vmem %s15_s7, 256  ;;  %p89_p4 = scmp.lt.s32.totalorder %s15_s7, %s15_s7 }
   0x9   :  { %p85_p3 = scmp.ne.s32.totalorder %s15_s7, %s84_s15  ;;  %p90_p5 = scmp.lt.s32.totalorder %s84_s15, %s84_s15 }
   0xb   :  { %p91_p6 = por %p90_p5, %p89_p4 }
   0xd   :  { %p92_p7 = pnand %p91_p6, %p85_p3 }
   0xf   :  { %95 = shalt.err (!%p92_p7)
}
  0x10   :  { %17 = dma.hbm_to_vmem [thread:$0]  %s158_s0, 256, %s15_s7, [#allocation3]  }
  0x11   :  { %118 = dma.done.wait [#allocation3], 256  }
  0x12   :  { %119 = vsyncadd [#allocation3], 4294967040  ;;  %v21_v0 = vld [vmem:[#allocation2] sm:$0xff]  ;;  %v22_v1 = vld [vmem:[#allocation2 + $0x8] sm:$0xff]  ;;  %s123_s0 = smov [#allocation5]  }
  0x13   :  { %v23_v2 = vmul.f32 %v21_v0, %v21_v0  ;;  %v24_v3 = vmul.f32 %v22_v1, %v22_v1  ;;  %s55_s18 = sshll.u32 %s123_s0, 4  ;;  %s56_s18 = int_to_ptr.vmem [resolvable:$true] %s55_s18 }
  0x14   :  { %s96_s19 = scalar_lea.vmem %s56_s18, 256  ;;  %p101_p9 = scmp.lt.s32.totalorder %s56_s18, %s56_s18 }
  0x15   :  { %v25_v4 = vmul.f32 %v23_v2, %v21_v0  ;;  %v26_v5 = vmul.f32 %v24_v3, %v22_v1  ;;  %p97_p8 = scmp.ne.s32.totalorder %s56_s18, %s96_s19  ;;  %p102_p10 = scmp.lt.s32.totalorder %s96_s19, %s96_s19 }
  0x17   :  { %v27_v6 = vmul.f32 0.044715, %v25_v4  ;;  %v28_v7 = vmul.f32 0.044715, %v26_v5  ;;  %p103_p11 = por %p102_p10, %p101_p9 }
  0x19   :  { %v29_v8 = vadd.f32 %v27_v6, %v21_v0  ;;  %v30_v9 = vadd.f32 %v28_v7, %v22_v1  ;;  %p104_p12 = pnand %p103_p11, %p97_p8 }
  0x1b   :  { %v31_v10 = vmul.f32 0.7978846, %v29_v8  ;;  %v32_v11 = vmul.f32 0.7978846, %v30_v9 }
  0x1d   :  { %70 = vtanh.f32 %v31_v10 }
  0x1e   :  { %72 = vtanh.f32 %v32_v11 }
  0x27   :  { %v71_v12 = vpop.eup %70 }
  0x28   :  { %v73_v13 = vpop.eup %72  ;;  %v35_v14 = vadd.f32 1.0, %v71_v12 }
  0x29   :  { %v36_v15 = vadd.f32 1.0, %v73_v13 }
  0x2a   :  { %v37_v16 = vmul.f32 0.5, %v35_v14 }
  0x2b   :  { %v38_v17 = vmul.f32 0.5, %v36_v15 }
  0x2c   :  { %v39_v18 = vmul.f32 15.0, %v37_v16 }
  0x2d   :  { %v40_v19 = vmul.f32 15.0, %v38_v17 }
  0x2e   :  { %v66_v20 = vround.rtne.f32 %v39_v18 }
  0x2f   :  { %v67_v21 = vround.rtne.f32 %v40_v19 }
  0x30   :  { %v43_v22 = vmul.f32 0.13333334, %v66_v20 }
  0x31   :  { %v44_v23 = vmul.f32 0.13333334, %v67_v21 }
  0x32   :  { %v64_v24 = vadd.f32 -1.0, %v43_v22 }
  0x33   :  { %v65_v25 = vadd.f32 -1.0, %v44_v23 }
  0x34   :  { %47 = vst [vmem:[#allocation5] sm:$0xff] %v64_v24 }
  0x35   :  { %48 = vst [vmem:[#allocation5 + $0x8] sm:$0xff] %v65_v25 }
  0x36   :  { %107 = shalt.err (!%p104_p12)
}
  0x37   :  { %s108_s22 = scalar_lea.hbm %s159_s1, 256 }
  0x38   :  { %p109_p13 = scmp.ne.s32.totalorder %s159_s1, %s108_s22  ;;  %p112_p0 = scmp.lt.u32.totalorder %s108_s22, %s159_s1 }
  0x3a   :  { %p114_p1 = pnand %p112_p0, %p109_p13 }
  0x3c   :  { %117 = shalt.err (!%p114_p1)
}
  0x3d   :  { %58 = dma.vmem_to_hbm [thread:$0]  %s56_s18, 256, %s159_s1, [#allocation4]  }
  0x3e   :  { %120 = dma.done.wait [#allocation4], 256  }
  0x3f   :  { %121 = vsyncadd [#allocation4], 4294967040 }
  0x40   :  { %62 = vsyncpa [#allocation3], 1 }
  0x41   :  { %63 = vsyncpa [#allocation4], 1 }

</bundles_post_ra>
